<compile_context>
chip_gen: v7x
topology: tpu7x:2x2x1
jax: 0.10.0
libtpu: 0.0.40
codegen_flags: <defaults>
</compile_context>

<pallas_src>
import jax
import jax.numpy as jnp
from jax.experimental import pallas as pl
from jax.experimental.pallas import tpu as pltpu


def _round_up(a: int, b: int) -> int:
    return (a + b - 1) // b * b


def highway_kernel(x_ref, wp_ref, bp_ref, wg_ref, bg_ref, o_ref):
    """out = relu(x@Wp^T+bp) * g + (1-g) * x,  g = sigmoid(x@Wg^T+bg)."""
    x = x_ref[...]                                       # (tm, D)
    xf = x.astype(jnp.float32)
    zp = jnp.dot(x, wp_ref[...], preferred_element_type=jnp.float32) + bp_ref[...]
    zg = jnp.dot(x, wg_ref[...], preferred_element_type=jnp.float32) + bg_ref[...]
    proj = jnp.maximum(zp, 0.0)                          # relu      (VPU)
    gate = jax.nn.sigmoid(zg)                            # sigmoid   (EUP)
    # gate*proj + (1-gate)*x  ==  gate*(proj - x) + x    (one fewer VPU mul)
    o_ref[...] = (gate * (proj - xf) + xf).astype(o_ref.dtype)


def _tpu_vmem_and_cores():
    """(per-TensorCore VMEM bytes, TensorCores per chip), with safe fallbacks."""
    vmem_bytes = 64 * 1024 * 1024          # conservative default (v7x per-TC)
    num_cores = 1
    got_info = False
    try:
        info = pltpu.get_tpu_info()
        vmem_bytes = int(getattr(info, "vmem_capacity_bytes", vmem_bytes))
        num_cores = int(getattr(info, "num_cores",
                                getattr(info, "num_tensorcores", 1)))
        got_info = True
    except Exception:
        pass
    # v7x exposes 64 MiB per TensorCore and has 2 TCs/chip; v5e/v6e have
    # 128 MiB and a single TC.  Infer the core count if it wasn't reported.
    if got_info and num_cores <= 1 and vmem_bytes <= 64 * 1024 * 1024:
        num_cores = 2
    return vmem_bytes, num_cores


def prepare_highway_params(w_proj, b_proj, w_gate, b_gate, dtype=None):
    """One-time prep: transpose nn.Linear (out,in) weights, reshape biases."""
    if dtype is None:
        dtype = jnp.asarray(w_proj).dtype
    wp_t = jnp.asarray(w_proj, dtype).T                  # (D, D): used as x @ Wp^T
    wg_t = jnp.asarray(w_gate, dtype).T
    bp = jnp.asarray(b_proj, jnp.float32).reshape(1, -1)
    bg = jnp.asarray(b_gate, jnp.float32).reshape(1, -1)
    return wp_t, bp, wg_t, bg


def highway_apply(params, x, *, tm=None):
    """Highway forward pass.  x: (N, D); params from prepare_highway_params."""
    wp_t, bp, wg_t, bg = params
    N, D = x.shape
    assert wp_t.shape == (D, D) and wg_t.shape == (D, D)
    itemsize = jnp.dtype(x.dtype).itemsize
    row_align = {4: 8, 2: 16, 1: 32}.get(itemsize, 8)    # sublane packing per dtype

    vmem_phys, num_tc = _tpu_vmem_and_cores()
    vmem_limit = min(vmem_phys * 3 // 4, 100 * 1024 * 1024)   # ~96 MiB v5e/v6e, ~48 MiB v7x
    vmem_budget = max(4 * 1024 * 1024, vmem_limit - 8 * 1024 * 1024)

    def vmem_est(t):
        tiles = 2 * (2 * t * D * itemsize)        # x + out tiles, double-buffered
        weights = 2 * (2 * D * D * itemsize)      # Wp^T + Wg^T, double-buffered
        biases = 2 * (2 * D * 4)                  # f32 biases, double-buffered
        interm = 5 * t * D * 4                    # f32 z/proj/gate/xf temporaries
        return tiles + weights + biases + interm

    if tm is None:
        # Target ~2 MiB of x per grid step so HBM streaming amortizes the
        # ~0.35 us per-step pipeline overhead; never more rows than N needs.
        tm_cap = (2 * 1024 * 1024) // max(1, D * itemsize)
        tm_cap = max(row_align, min(8192, tm_cap) // row_align * row_align)
        tm = min(tm_cap, _round_up(N, row_align))
        while tm > row_align and vmem_est(tm) > vmem_budget:
            tm = max(row_align, _round_up(tm // 2, row_align))
        # Only on multi-TensorCore parts (v7x): keep >= num_tc grid steps so
        # the "parallel" batch axis can actually be sharded across cores.
        if num_tc > 1 and tm > row_align and pl.cdiv(N, tm) < num_tc:
            tm = max(row_align, _round_up(pl.cdiv(N, num_tc), row_align))
    else:
        tm = max(row_align, _round_up(tm, row_align))

    # Make sure the scoped-VMEM limit covers what we plan to use (large D keeps
    # the resident weights big); best effort up to ~90% of physical VMEM.
    # TODO(synk): add a K-tiled accumulator path (extra grid axis over D with a
    # pl.when-initialized f32 scratch) for very large D, where even the single
    # resident weight pair exceeds v7x's 64 MiB VMEM.
    need = vmem_est(tm) + 4 * 1024 * 1024
    if need > vmem_limit:
        vmem_limit = min(vmem_phys * 9 // 10, need)

    grid = (pl.cdiv(N, tm),)
    return pl.pallas_call(
        highway_kernel,
        out_shape=jax.ShapeDtypeStruct((N, D), x.dtype),
        grid_spec=pltpu.PrefetchScalarGridSpec(
            num_scalar_prefetch=0,
            grid=grid,
            in_specs=[
                pl.BlockSpec((tm, D), lambda i: (i, 0)),   # x tile (partial last block OK)
                pl.BlockSpec((D, D), lambda i: (0, 0)),    # Wp^T, grid-invariant
                pl.BlockSpec((1, D), lambda i: (0, 0)),    # bp (f32)
                pl.BlockSpec((D, D), lambda i: (0, 0)),    # Wg^T, grid-invariant
                pl.BlockSpec((1, D), lambda i: (0, 0)),    # bg (f32)
            ],
            out_specs=pl.BlockSpec((tm, D), lambda i: (i, 0)),
        ),
        compiler_params=pltpu.CompilerParams(
            dimension_semantics=("parallel",),
            vmem_limit_bytes=int(vmem_limit),
        ),
    )(x, wp_t, bp, wg_t, bg)


def highway(x, w_proj, b_proj, w_gate, b_gate, *, tm=None):
    """Convenience wrapper (prefer prepare_highway_params once + highway_apply)."""
    params = prepare_highway_params(w_proj, b_proj, w_gate, b_gate, dtype=x.dtype)
    return highway_apply(params, x, tm=tm)


def highway_ref(x, w_proj, b_proj, w_gate, b_gate):
    """Pure-JAX reference with PyTorch nn.Linear weight layout (out, in)."""
    proj = jax.nn.relu(x @ w_proj.T + b_proj)
    gate = jax.nn.sigmoid(x @ w_gate.T + b_gate)
    return proj * gate + (1.0 - gate) * x


if __name__ == "__main__":
    word_embed_size = 32
    batch = 8

    key = jax.random.PRNGKey(0)
    kx, kwp, kbp, kwg, kbg, kx2, kx3 = jax.random.split(key, 7)

    x = jax.random.normal(kx, (batch, word_embed_size), dtype=jnp.float32)
    # nn.Linear layout: weight is (out_features, in_features).
    w_proj = jax.random.normal(kwp, (word_embed_size, word_embed_size),
                               dtype=jnp.float32) * 0.1
    b_proj = jax.random.normal(kbp, (word_embed_size,), dtype=jnp.float32) * 0.1
    w_gate = jax.random.normal(kwg, (word_embed_size, word_embed_size),
                               dtype=jnp.float32) * 0.1
    b_gate = jax.random.normal(kbg, (word_embed_size,), dtype=jnp.float32) * 0.1

    # One-time parameter prep (transpose + bias reshape), reused across calls.
    params = prepare_highway_params(w_proj, b_proj, w_gate, b_gate)

    out = jax.block_until_ready(highway_apply(params, x))
    ref = highway_ref(x, w_proj, b_proj, w_gate, b_gate)
    assert out.shape == (batch, word_embed_size)
    assert jnp.allclose(out, ref, atol=1e-5, rtol=1e-5), "mismatch vs reference"

    # Partial trailing block on the row axis (N not a multiple of the tile).
    x2 = jax.random.normal(kx2, (10, word_embed_size), dtype=jnp.float32)
    out2 = jax.block_until_ready(highway_apply(params, x2))
    ref2 = highway_ref(x2, w_proj, b_proj, w_gate, b_gate)
    assert out2.shape == (10, word_embed_size)
    assert jnp.allclose(out2, ref2, atol=1e-5, rtol=1e-5), "mismatch (partial block)"

    # Multi-step grid with a ragged last block (exercises the cdiv path).
    x3 = jax.random.normal(kx3, (1000, word_embed_size), dtype=jnp.float32)
    out3 = jax.block_until_ready(highway_apply(params, x3, tm=256))
    ref3 = highway_ref(x3, w_proj, b_proj, w_gate, b_gate)
    assert out3.shape == (1000, word_embed_size)
    assert jnp.allclose(out3, ref3, atol=1e-5, rtol=1e-5), "mismatch (multi-step)"

    print("KERNEL_OK")
</pallas_src>

<mosaic_0001>
module attributes {stable_mosaic.version = 11 : i64} {
  func.func @highway_kernel(%arg0: i32, %arg1: memref<8x32xf32, #tpu.memory_space<vmem>>, %arg2: memref<32x32xf32, #tpu.memory_space<vmem>>, %arg3: memref<1x32xf32, #tpu.memory_space<vmem>>, %arg4: memref<32x32xf32, #tpu.memory_space<vmem>>, %arg5: memref<1x32xf32, #tpu.memory_space<vmem>>, %arg6: memref<8x32xf32, #tpu.memory_space<vmem>>) attributes {dimension_semantics = [#tpu.dimension_semantics<parallel>], iteration_bounds = array<i64: 1>, scalar_prefetch = 0 : i64, scratch_operands = 0 : i64, tpu.core_type = #tpu.core_type<tc>, window_params = [{transform_indices = @transform_0, window_bounds = array<i64: 8, 32>}, {pipeline_mode = #tpu.pipeline_mode<synchronous>, transform_indices = @transform_1, window_bounds = array<i64: 32, 32>}, {pipeline_mode = #tpu.pipeline_mode<synchronous>, transform_indices = @transform_2, window_bounds = array<i64: 1, 32>}, {pipeline_mode = #tpu.pipeline_mode<synchronous>, transform_indices = @transform_3, window_bounds = array<i64: 32, 32>}, {pipeline_mode = #tpu.pipeline_mode<synchronous>, transform_indices = @transform_4, window_bounds = array<i64: 1, 32>}, {transform_indices = @transform_5, window_bounds = array<i64: 8, 32>}]} {
    %c0 = arith.constant 0 : index
    %c0_0 = arith.constant 0 : index
    %0 = vector.load %arg1[%c0, %c0_0] : memref<8x32xf32, #tpu.memory_space<vmem>>, vector<8x32xf32>
    %c0_1 = arith.constant 0 : index
    %c0_2 = arith.constant 0 : index
    %1 = vector.load %arg2[%c0_1, %c0_2] : memref<32x32xf32, #tpu.memory_space<vmem>>, vector<32x32xf32>
    %cst = arith.constant dense<0.000000e+00> : vector<8x32xf32>
    %2 = tpu.matmul %0, %1, %cst {dimension_numbers = #tpu.dot_dimension_numbers<[1], [0], [0], [1], [0, 0, 1, 1], [], []>} : vector<8x32xf32>, vector<32x32xf32>, vector<8x32xf32> -> vector<8x32xf32>
    %c0_3 = arith.constant 0 : index
    %c0_4 = arith.constant 0 : index
    %3 = vector.load %arg3[%c0_3, %c0_4] : memref<1x32xf32, #tpu.memory_space<vmem>>, vector<1x32xf32>
    %4 = vector.broadcast %3 : vector<1x32xf32> to vector<8x32xf32>
    %5 = arith.addf %2, %4 : vector<8x32xf32>
    %c0_5 = arith.constant 0 : index
    %c0_6 = arith.constant 0 : index
    %6 = vector.load %arg4[%c0_5, %c0_6] : memref<32x32xf32, #tpu.memory_space<vmem>>, vector<32x32xf32>
    %cst_7 = arith.constant dense<0.000000e+00> : vector<8x32xf32>
    %7 = tpu.matmul %0, %6, %cst_7 {dimension_numbers = #tpu.dot_dimension_numbers<[1], [0], [0], [1], [0, 0, 1, 1], [], []>} : vector<8x32xf32>, vector<32x32xf32>, vector<8x32xf32> -> vector<8x32xf32>
    %c0_8 = arith.constant 0 : index
    %c0_9 = arith.constant 0 : index
    %8 = vector.load %arg5[%c0_8, %c0_9] : memref<1x32xf32, #tpu.memory_space<vmem>>, vector<1x32xf32>
    %9 = vector.broadcast %8 : vector<1x32xf32> to vector<8x32xf32>
    %10 = arith.addf %7, %9 : vector<8x32xf32>
    %cst_10 = arith.constant 0.000000e+00 : f32
    %11 = vector.broadcast %cst_10 : f32 to vector<8x32xf32>
    %12 = arith.maximumf %5, %11 : vector<8x32xf32>
    %13 = arith.negf %10 : vector<8x32xf32>
    %14 = math.exp %13 : vector<8x32xf32>
    %cst_11 = arith.constant 1.000000e+00 : f32
    %15 = vector.broadcast %cst_11 : f32 to vector<8x32xf32>
    %16 = arith.addf %15, %14 : vector<8x32xf32>
    %17 = arith.divf %15, %16 : vector<8x32xf32>
    %18 = arith.subf %12, %0 : vector<8x32xf32>
    %19 = arith.mulf %17, %18 : vector<8x32xf32>
    %20 = arith.addf %19, %0 : vector<8x32xf32>
    %c0_12 = arith.constant 0 : index
    %c0_13 = arith.constant 0 : index
    %21 = vector.load %arg6[%c0_12, %c0_13] : memref<8x32xf32, #tpu.memory_space<vmem>>, vector<8x32xf32>
    tpu.vector_store %arg6[%c0_12, %c0_13], %20 {strides = array<i32>} : memref<8x32xf32, #tpu.memory_space<vmem>>, vector<8x32xf32>,
    return
  }
  func.func @transform_0(%arg0: i32) -> (i32, i32) {
    %c0_i32 = arith.constant 0 : i32
    %c0_i32_0 = arith.constant 0 : i32
    return %arg0, %c0_i32 : i32, i32
  }
  func.func @transform_1(%arg0: i32) -> (i32, i32) {
    %c0_i32 = arith.constant 0 : i32
    %c0_i32_0 = arith.constant 0 : i32
    %c0_i32_1 = arith.constant 0 : i32
    return %c0_i32, %c0_i32_0 : i32, i32
  }
  func.func @transform_2(%arg0: i32) -> (i32, i32) {
    %c0_i32 = arith.constant 0 : i32
    %c0_i32_0 = arith.constant 0 : i32
    %c0_i32_1 = arith.constant 0 : i32
    return %c0_i32, %c0_i32_0 : i32, i32
  }
  func.func @transform_3(%arg0: i32) -> (i32, i32) {
    %c0_i32 = arith.constant 0 : i32
    %c0_i32_0 = arith.constant 0 : i32
    %c0_i32_1 = arith.constant 0 : i32
    return %c0_i32, %c0_i32_0 : i32, i32
  }
  func.func @transform_4(%arg0: i32) -> (i32, i32) {
    %c0_i32 = arith.constant 0 : i32
    %c0_i32_0 = arith.constant 0 : i32
    %c0_i32_1 = arith.constant 0 : i32
    return %c0_i32, %c0_i32_0 : i32, i32
  }
  func.func @transform_5(%arg0: i32) -> (i32, i32) {
    %c0_i32 = arith.constant 0 : i32
    %c0_i32_0 = arith.constant 0 : i32
    return %arg0, %c0_i32 : i32, i32
  }
}

</mosaic_0001>

<bundles_post_ra>
// kernel: tpu_custom_call.1
= control target key start
LH: loop header
LB: loop body
LE: loop exit
PB: predicated region body
PF: predicated region fallthrough
CT: control target
= control target key end

     0   :  { %10 = vsyncpa [#allocation3], 0  ;;  %s512_s0 = inlined_call_operand.hbm [shape: f32[8,32], index: 0, kind: input, shape index: {}]   ;;  %s513_s1 = inlined_call_operand.hbm [shape: f32[32,32], index: 1, kind: input, shape index: {}]   ;;  %s514_s2 = inlined_call_operand.vmem [shape: f32[1,32], index: 2, kind: input, shape index: {}]   ;;  %s515_s3 = inlined_call_operand.hbm [shape: f32[32,32], index: 3, kind: input, shape index: {}]   ;;  %s516_s4 = inlined_call_operand.vmem [shape: f32[1,32], index: 4, kind: input, shape index: {}]   ;;  %s517_s5 = inlined_call_operand.hbm [shape: f32[8,32], index: 5, kind: output, shape index: {}]  }
   0x1   :  { %11 = vsyncpa [#allocation6], 0 }
   0x2   :  { %12 = vsyncpa [#allocation4], 0  ;;  %s410_s18 = smov [#allocation5]   ;;  %s316_s22 = scalar_lea.hbm %s513_s1, 512 }
   0x3   :  { %s28_s19 = sshll.u32 %s410_s18, 4  ;;  %p317_p0 = scmp.ne.s32.totalorder %s513_s1, %s316_s22  ;;  %s29_s19 = int_to_ptr.vmem [resolvable:$true] %s28_s19 }
   0x4   :  { %p320_p1 = scmp.lt.u32.totalorder %s316_s22, %s513_s1 }
   0x6   :  { %p322_p2 = pnand %p320_p1, %p317_p0 }
   0x8   :  { %325 = shalt.err (!%p322_p2)
}
   0x9   :  { %s326_s27 = scalar_lea.vmem %s29_s19, 512  ;;  %p331_p4 = scmp.lt.s32.totalorder %s29_s19, %s29_s19 }
   0xa   :  { %p327_p3 = scmp.ne.s32.totalorder %s29_s19, %s326_s27  ;;  %p332_p5 = scmp.lt.s32.totalorder %s326_s27, %s326_s27 }
   0xc   :  { %p333_p6 = por %p332_p5, %p331_p4 }
   0xe   :  { %p334_p7 = pnand %p333_p6, %p327_p3 }
  0x10   :  { %337 = shalt.err (!%p334_p7)
}
  0x11   :  { %s411_s28 = smov 128   ;;  %s412_s29 = smov 8  }
  0x12   :  { %34 = dma.hbm_to_vmem [thread:$0]  %s513_s1, 512, %s29_s19, [#allocation6], %s411_s28, %s411_s28, %s412_s29  }
  0x13   :  { %s413_s7 = smov [#allocation2]   ;;  %s414_s9 = smov [#allocation7]  }
  0x14   :  { %s19_s8 = sshll.u32 %s413_s7, 4  ;;  %s42_s10 = sshll.u32 %s414_s9, 4  ;;  %s20_s8 = int_to_ptr.vmem [resolvable:$true] %s19_s8  ;;  %s43_s10 = int_to_ptr.vmem [resolvable:$true] %s42_s10 }
  0x15   :  { %s338_s13 = scalar_lea.hbm %s512_s0, 128 }
  0x16   :  { %p339_p8 = scmp.ne.s32.totalorder %s512_s0, %s338_s13  ;;  %p342_p9 = scmp.lt.u32.totalorder %s338_s13, %s512_s0 }
  0x18   :  { %p344_p10 = pnand %p342_p9, %p339_p8 }
  0x1a   :  { %347 = shalt.err (!%p344_p10)
}
  0x1b   :  { %s348_s1 = scalar_lea.vmem %s20_s8, 128  ;;  %p353_p12 = scmp.lt.s32.totalorder %s20_s8, %s20_s8 }
  0x1c   :  { %p349_p11 = scmp.ne.s32.totalorder %s20_s8, %s348_s1  ;;  %p354_p13 = scmp.lt.s32.totalorder %s348_s1, %s348_s1 }
  0x1e   :  { %p355_p0 = por %p354_p13, %p353_p12 }
  0x20   :  { %p356_p1 = pnand %p355_p0, %p349_p11 }
  0x22   :  { %359 = shalt.err (!%p356_p1)
}
  0x23   :  { %22 = dma.hbm_to_vmem [thread:$0]  %s512_s0, 128, %s20_s8, [#allocation3]  }
  0x24   :  { %s360_s22 = scalar_lea.hbm %s515_s3, 512 }
  0x25   :  { %p361_p2 = scmp.ne.s32.totalorder %s515_s3, %s360_s22  ;;  %p364_p3 = scmp.lt.u32.totalorder %s360_s22, %s515_s3 }
  0x27   :  { %p366_p4 = pnand %p364_p3, %p361_p2 }
  0x29   :  { %369 = shalt.err (!%p366_p4)
}
  0x2a   :  { %s370_s27 = scalar_lea.vmem %s43_s10, 512  ;;  %p375_p6 = scmp.lt.s32.totalorder %s43_s10, %s43_s10 }
  0x2b   :  { %p371_p5 = scmp.ne.s32.totalorder %s43_s10, %s370_s27  ;;  %p376_p7 = scmp.lt.s32.totalorder %s370_s27, %s370_s27 }
  0x2d   :  { %p377_p8 = por %p376_p7, %p375_p6 }
  0x2f   :  { %p378_p9 = pnand %p377_p8, %p371_p5 }
  0x31   :  { %381 = shalt.err (!%p378_p9)
}
  0x32   :  { %48 = dma.hbm_to_vmem [thread:$0]  %s515_s3, 512, %s43_s10, [#allocation6], %s411_s28, %s411_s28, %s412_s29  }
  0x33   :  { %404 = dma.done.wait [#allocation3], 128  }
  0x34   :  { %405 = vsyncadd [#allocation3], 4294967168 }
  0x35   :  { %406 = dma.done.wait [#allocation6], 1024  }
  0x36   :  { %407 = vsyncadd [#allocation6], 4294966272  ;;  %v415_v0 = vmov 0.0|0.0   ;;  %vm416_vm0 = vmmov 0   ;;  %v417_v1 = vmov 0.0   ;;  %v146_v2 = vld [vmem:[#allocation7] sm:$0xff] }
  0x37   :  { %297 = vmatprep.subr.bf16.mxu1 %v415_v0  ;;  %288 = vmatprep.mubr.msk.f32.mxu1 %vm416_vm0, %v417_v1  ;;  %v147_v3 = vld [vmem:[#allocation7 + $0x8] sm:$0xff]  ;;  %v148_v4 = vld [vmem:[#allocation7 + $0x10] sm:$0xff]  ;;  %v149_v6 = vld [vmem:[#allocation7 + $0x18] sm:$0xff]  ;;  %vm72_vm1 = vcmask 261120   ;;  %s418_s7 = smov [#allocation8]  }
  0x38   :  { %291 = vmatprep.subr.bf16.mxu0 %v415_v0  ;;  %277 = vmatprep.mubr.msk.f32.mxu0 %vm416_vm0, %v417_v1  ;;  %v298_v5 = vpack.c.bf16 %v147_v3, %v146_v2  ;;  %v61_v7 = vld [vmem:[#allocation5] sm:$0xff]  ;;  %v62_v8 = vld [vmem:[#allocation5 + $0x8] sm:$0xff]  ;;  %v63_v9 = vld [vmem:[#allocation5 + $0x10] sm:$0xff]  ;;  %v301_v11 = vpack.c.bf16 %v149_v6, %v148_v4 }
  0x39   :  { %v64_v10 = vld [vmem:[#allocation5 + $0x18] sm:$0xff]  ;;  %v292_v12 = vpack.c.bf16 %v62_v8, %v61_v7 }
  0x3a   :  { %299 = vmatpush3.bf16.msra.mxu1 %v298_v5  ;;  %v295_v13 = vpack.c.bf16 %v64_v10, %v63_v9  ;;  %v60_v14 = vld [vmem:[#allocation2] sm:$0xff] }
  0x3b   :  { %300 = vmatprep.subr.bf16.mxu1 %v415_v0  ;;  %293 = vmatpush3.bf16.msra.mxu0 %v292_v12  ;;  %v256_v15 = vld [vmem:[%s516_s4] ss:$0 sm:$0xff]  ;;  %s244_s4 = sshll.u32 %s418_s7, 4  ;;  %s245_s4 = int_to_ptr.vmem [resolvable:$true] %s244_s4 }
  0x3c   :  { %294 = vmatprep.subr.bf16.mxu0 %v415_v0  ;;  %v254_v22 = vld [vmem:[%s514_s2] ss:$0 sm:$0xff]  ;;  %s382_s8 = scalar_lea.vmem %s245_s4, 128  ;;  %p387_p11 = scmp.lt.s32.totalorder %s245_s4, %s245_s4 }
  0x3d   :  { %p383_p10 = scmp.ne.s32.totalorder %s245_s4, %s382_s8  ;;  %p388_p12 = scmp.lt.s32.totalorder %s382_s8, %s382_s8 }
  0x3e   :  { %302 = vmatpush3.bf16.msra.mxu1 %v301_v11 }
  0x3f   :  { %296 = vmatpush3.bf16.msra.mxu0 %v295_v13  ;;  %p389_p13 = por %p388_p12, %p387_p11 }
  0x41   :  { %289 = vmatmul.mubr.msk.f32.vlgmr.msra.gmra.mrb[0].mxu1 %vm72_vm1, %v60_v14  ;;  %p390_p0 = pnand %p389_p13, %p383_p10 }
  0x42   :  { %278 = vmatmul.mubr.msk.f32.vlgmr.msra.gmra.mrb[0].mxu0 %vm72_vm1, %v60_v14 }
 0x114   :  { %v223_v16 = vpop.f32.mrb[0].mxu1 }
 0x115   :  { %v224_v17 = vadd.f32 %v256_v15, %v223_v16  ;;  %v290_v18 = vpop.f32.mrb[1].mxu1  ;;  %v142_v19 = vpop.f32.mrb[0].mxu0 }
 0x116   :  { %v279_v21 = vpop.f32.mrb[1].mxu0  ;;  %v143_v25 = vadd.f32 %v254_v22, %v142_v19 }
 0x117   :  { %v258_v20 = vmul.f32 -1.442695, %v224_v17 }
 0x118   :  { %v227_v26 = vmax.f32 %v143_v25, 0.0 }
 0x119   :  { %312 = vpow2.f32 %v258_v20 }
 0x11a   :  { %v234_v27 = vsub.f32 %v227_v26, %v60_v14 }
 0x123   :  { %v313_v23 = vpop.eup %312 }
 0x124   :  { %v231_v24 = vadd.f32 1.0, %v313_v23 }
 0x126   :  { %314 = vrcp.f32 %v231_v24 }
 0x130   :  { %v315_v28 = vpop.eup %314 }
 0x131   :  { %v235_v29 = vmul.f32 %v315_v28, %v234_v27 }
 0x133   :  { %v236_v30 = vadd.f32 %v235_v29, %v60_v14 }
 0x135   :  { %237 = vst.msk [vmem:[#allocation8] sm:$0xff] %vm72_vm1, %v236_v30 }
 0x136   :  { %393 = shalt.err (!%p390_p0)
}
 0x137   :  { %s394_s10 = scalar_lea.hbm %s517_s5, 128 }
 0x138   :  { %p395_p1 = scmp.ne.s32.totalorder %s517_s5, %s394_s10  ;;  %p398_p2 = scmp.lt.u32.totalorder %s394_s10, %s517_s5 }
 0x13a   :  { %p400_p3 = pnand %p398_p2, %p395_p1 }
 0x13c   :  { %403 = shalt.err (!%p400_p3)
}
 0x13d   :  { %247 = dma.vmem_to_hbm [thread:$0]  %s245_s4, 128, %s517_s5, [#allocation4]  }
 0x13e   :  { %408 = dma.done.wait [#allocation4], 128  }
 0x13f   :  { %409 = vsyncadd [#allocation4], 4294967168 }
 0x140   :  { %251 = vsyncpa [#allocation3], 1 }
 0x141   :  { %252 = vsyncpa [#allocation6], 1 }
 0x142   :  { %253 = vsyncpa [#allocation4], 1 }

</bundles_post_ra>
